<compile_context>
chip_gen: v7x
topology: tpu7x:2x2x1
jax: 0.10.0
libtpu: 0.0.40
codegen_flags: <defaults>
</compile_context>

<pallas_src>
import functools

import jax
import jax.numpy as jnp
from jax.experimental import pallas as pl
from jax.experimental.pallas import tpu as pltpu

EPS = 1e-5


def _conv3_im2col(y, w2d, mask_l, mask_r):
    """3-tap conv (pad=1) as a single matmul.

    y:    (Cin, NL) slab (N samples of length L concatenated along lanes)
    w2d:  (Cout, 3*Cin) = [w[:,:,0] | w[:,:,1] | w[:,:,2]]
    mask_l / mask_r: (1, NL) validity masks for the j-1 / j+1 taps
    """
    rows = y.shape[0]
    zero_col = jnp.zeros((rows, 1), y.dtype)
    y_m1 = jnp.concatenate([zero_col, y[:, :-1]], axis=1)   # y[j-1]
    y_p1 = jnp.concatenate([y[:, 1:], zero_col], axis=1)    # y[j+1]
    y_m1 = jnp.where(mask_l, y_m1, 0.0)                     # zero across sample edges
    y_p1 = jnp.where(mask_r, y_p1, 0.0)
    col = jnp.concatenate([y_m1, y, y_p1], axis=0)          # (3*Cin, NL)
    return jnp.dot(w2d, col, preferred_element_type=jnp.float32)


def _batchnorm_fused(y, gamma, beta):
    """Training-mode BatchNorm1d over the folded (N*L) axis, single fused pass."""
    inv_n = 1.0 / y.shape[1]
    mean = jnp.sum(y, axis=1, keepdims=True) * inv_n
    mean_sq = jnp.sum(y * y, axis=1, keepdims=True) * inv_n
    var = mean_sq - mean * mean                              # biased variance
    scale = gamma * jax.lax.rsqrt(var + EPS)                 # (C, 1)
    shift = beta - mean * scale
    return y * scale + shift


def basic_block_kernel(x_ref, w1_ref, w2_ref, p_ref, o_ref, *, seq_len):
    x = x_ref[...].astype(jnp.float32)        # (Cin, N*L) lane-dense slab
    w1 = w1_ref[...].astype(jnp.float32)      # (Cout, 3*Cin)
    w2 = w2_ref[...].astype(jnp.float32)      # (Cout, 3*Cout)
    p = p_ref[...].astype(jnp.float32)        # (Cout, 4) = [g1 | b1 | g2 | b2]
    g1, b1, g2, b2 = p[:, 0:1], p[:, 1:2], p[:, 2:3], p[:, 3:4]

    nl = x.shape[1]
    pos = jax.lax.broadcasted_iota(jnp.int32, (1, nl), 1) % seq_len
    mask_l = pos != 0                 # j-1 tap valid (not at a sample start)
    mask_r = pos != seq_len - 1       # j+1 tap valid (not at a sample end)

    # conv1 -> bn1 -> relu
    out = _conv3_im2col(x, w1, mask_l, mask_r)
    out = jnp.maximum(_batchnorm_fused(out, g1, b1), 0.0)
    # conv2 -> bn2
    out = _conv3_im2col(out, w2, mask_l, mask_r)
    out = _batchnorm_fused(out, g2, b2)
    # residual add (identity shortcut: stride=1, downsample=None) + relu
    out = jnp.maximum(out + x, 0.0)
    o_ref[...] = out.astype(o_ref.dtype)


def basic_block(x, w1, g1, b1, w2, g2, b2):
    N, C, L = x.shape
    Cout = w1.shape[0]

    # Layout plumbing in the wrapper (not compute): lane-dense slab + im2col weights.
    x_slab = jnp.transpose(x, (1, 0, 2)).reshape(C, N * L)            # (C, N*L)
    w1_2d = jnp.transpose(w1, (0, 2, 1)).reshape(Cout, 3 * C)         # [k0|k1|k2]
    w2_2d = jnp.transpose(w2, (0, 2, 1)).reshape(Cout, 3 * Cout)
    params = jnp.concatenate(
        [g1.reshape(Cout, 1), b1.reshape(Cout, 1),
         g2.reshape(Cout, 1), b2.reshape(Cout, 1)], axis=1)           # (Cout, 4)

    vmem = pl.BlockSpec(memory_space=pltpu.MemorySpace.VMEM)
    out_slab = pl.pallas_call(
        functools.partial(basic_block_kernel, seq_len=L),
        out_shape=jax.ShapeDtypeStruct((Cout, N * L), x.dtype),
        in_specs=[vmem, vmem, vmem, vmem],
        out_specs=vmem,
    )(x_slab, w1_2d, w2_2d, params)

    return jnp.transpose(out_slab.reshape(Cout, N, L), (1, 0, 2))     # (N, Cout, L)


def reference(x, w1, g1, b1, w2, g2, b2):
    """Pure-JAX reference matching PyTorch BasicBlock.forward (train-mode BN)."""
    def conv(y, w):
        return jax.lax.conv_general_dilated(
            y, w, window_strides=(1,), padding=((1, 1),),
            dimension_numbers=("NCH", "OIH", "NCH"))

    def bn(y, g, b):
        m = jnp.mean(y, axis=(0, 2), keepdims=True)
        v = jnp.mean((y - m) ** 2, axis=(0, 2), keepdims=True)
        C = y.shape[1]
        return (y - m) / jnp.sqrt(v + EPS) * g.reshape(1, C, 1) + b.reshape(1, C, 1)

    out = jax.nn.relu(bn(conv(x, w1), g1, b1))
    out = bn(conv(out, w2), g2, b2)
    return jax.nn.relu(out + x)


if __name__ == "__main__":
    N, C, L = 2, 4, 16          # inplanes = planes = 4, stride = 1, no downsample
    key = jax.random.PRNGKey(0)
    k_x, k_w1, k_w2, k_g1, k_b1, k_g2, k_b2 = jax.random.split(key, 7)

    x = jax.random.normal(k_x, (N, C, L), jnp.float32)
    w1 = jax.random.normal(k_w1, (C, C, 3), jnp.float32) * 0.2    # conv1 weight
    w2 = jax.random.normal(k_w2, (C, C, 3), jnp.float32) * 0.2    # conv2 weight
    g1 = jax.random.uniform(k_g1, (C, 1), jnp.float32, 0.5, 1.5)  # bn1 gamma
    b1 = jax.random.normal(k_b1, (C, 1), jnp.float32) * 0.1       # bn1 beta
    g2 = jax.random.uniform(k_g2, (C, 1), jnp.float32, 0.5, 1.5)  # bn2 gamma
    b2 = jax.random.normal(k_b2, (C, 1), jnp.float32) * 0.1       # bn2 beta

    out = basic_block(x, w1, g1, b1, w2, g2, b2)
    out = jax.block_until_ready(out)

    ref = jax.block_until_ready(reference(x, w1, g1, b1, w2, g2, b2))
    assert out.shape == (N, C, L)
    assert jnp.max(jnp.abs(out - ref)) < 2e-4, "mismatch vs pure-JAX reference"

    print("KERNEL_OK")
</pallas_src>

<mosaic_0001>
module attributes {stable_mosaic.version = 11 : i64} {
  func.func @basic_block_kernel(%arg0: memref<4x32xf32, #tpu.memory_space<vmem>>, %arg1: memref<4x12xf32, #tpu.memory_space<vmem>>, %arg2: memref<4x12xf32, #tpu.memory_space<vmem>>, %arg3: memref<4x4xf32, #tpu.memory_space<vmem>>, %arg4: memref<4x32xf32, #tpu.memory_space<vmem>>) attributes {dimension_semantics = [], scalar_prefetch = 0 : i64, scratch_operands = 0 : i64, tpu.core_type = #tpu.core_type<tc>} {
    %c0 = arith.constant 0 : index
    %c0_0 = arith.constant 0 : index
    %0 = vector.load %arg0[%c0, %c0_0] : memref<4x32xf32, #tpu.memory_space<vmem>>, vector<4x32xf32>
    %c0_1 = arith.constant 0 : index
    %c0_2 = arith.constant 0 : index
    %1 = vector.load %arg1[%c0_1, %c0_2] : memref<4x12xf32, #tpu.memory_space<vmem>>, vector<4x12xf32>
    %c0_3 = arith.constant 0 : index
    %c0_4 = arith.constant 0 : index
    %2 = vector.load %arg2[%c0_3, %c0_4] : memref<4x12xf32, #tpu.memory_space<vmem>>, vector<4x12xf32>
    %c0_5 = arith.constant 0 : index
    %c0_6 = arith.constant 0 : index
    %3 = vector.load %arg3[%c0_5, %c0_6] : memref<4x4xf32, #tpu.memory_space<vmem>>, vector<4x4xf32>
    %4 = vector.extract_strided_slice %3 {offsets = [0, 0], sizes = [4, 1], strides = [1, 1]} : vector<4x4xf32> to vector<4x1xf32>
    %5 = vector.extract_strided_slice %3 {offsets = [0, 1], sizes = [4, 1], strides = [1, 1]} : vector<4x4xf32> to vector<4x1xf32>
    %6 = vector.extract_strided_slice %3 {offsets = [0, 2], sizes = [4, 1], strides = [1, 1]} : vector<4x4xf32> to vector<4x1xf32>
    %7 = vector.extract_strided_slice %3 {offsets = [0, 3], sizes = [4, 1], strides = [1, 1]} : vector<4x4xf32> to vector<4x1xf32>
    %8 = tpu.iota {dimensions = array<i32: 1>} : vector<1x32xi32>
    %c16_i32 = arith.constant 16 : i32
    %c0_i32 = arith.constant 0 : i32
    %9 = arith.cmpi eq, %c16_i32, %c0_i32 : i32
    %c1_i32 = arith.constant 1 : i32
    %10 = arith.select %9, %c1_i32, %c16_i32 : i32
    %11 = vector.broadcast %10 : i32 to vector<1x32xi32>
    %12 = arith.remsi %8, %11 : vector<1x32xi32>
    %c0_i32_7 = arith.constant 0 : i32
    %13 = vector.broadcast %c0_i32_7 : i32 to vector<1x32xi32>
    %14 = arith.cmpi ne, %12, %13 : vector<1x32xi32>
    %c0_i32_8 = arith.constant 0 : i32
    %15 = vector.broadcast %c0_i32_8 : i32 to vector<1x32xi32>
    %16 = arith.cmpi slt, %12, %15 : vector<1x32xi32>
    %c0_i32_9 = arith.constant 0 : i32
    %17 = arith.cmpi slt, %10, %c0_i32_9 : i32
    %18 = vector.broadcast %17 : i1 to vector<1x32xi1>
    %19 = vector.broadcast %18 : vector<1x32xi1> to vector<1x32xi1>
    %20 = arith.xori %16, %19 : vector<1x32xi1>
    %21 = arith.andi %20, %14 : vector<1x32xi1>
    %22 = vector.broadcast %10 : i32 to vector<1x32xi32>
    %23 = arith.addi %12, %22 : vector<1x32xi32>
    %24 = arith.select %21, %23, %12 : vector<1x32xi1>, vector<1x32xi32>
    %c0_i32_10 = arith.constant 0 : i32
    %25 = vector.broadcast %c0_i32_10 : i32 to vector<1x32xi32>
    %26 = arith.cmpi ne, %24, %25 : vector<1x32xi32>
    %c15_i32 = arith.constant 15 : i32
    %27 = vector.broadcast %c15_i32 : i32 to vector<1x32xi32>
    %28 = arith.cmpi ne, %24, %27 : vector<1x32xi32>
    %cst = arith.constant 0.000000e+00 : f32
    %29 = vector.broadcast %cst : f32 to vector<4x1xf32>
    %30 = vector.extract_strided_slice %0 {offsets = [0, 0], sizes = [4, 31], strides = [1, 1]} : vector<4x32xf32> to vector<4x31xf32>
    %31 = tpu.concatenate %29, %30 in 1 : vector<4x1xf32>, vector<4x31xf32> -> vector<4x32xf32>
    %32 = vector.extract_strided_slice %0 {offsets = [0, 1], sizes = [4, 31], strides = [1, 1]} : vector<4x32xf32> to vector<4x31xf32>
    %33 = tpu.concatenate %32, %29 in 1 : vector<4x31xf32>, vector<4x1xf32> -> vector<4x32xf32>
    %cst_11 = arith.constant 0.000000e+00 : f32
    %34 = vector.shape_cast %26 : vector<1x32xi1> to vector<1x32xi1>
    %35 = vector.broadcast %34 : vector<1x32xi1> to vector<4x32xi1>
    %36 = vector.broadcast %cst_11 : f32 to vector<4x32xf32>
    %37 = arith.select %35, %31, %36 : vector<4x32xi1>, vector<4x32xf32>
    %cst_12 = arith.constant 0.000000e+00 : f32
    %38 = vector.shape_cast %28 : vector<1x32xi1> to vector<1x32xi1>
    %39 = vector.broadcast %38 : vector<1x32xi1> to vector<4x32xi1>
    %40 = vector.broadcast %cst_12 : f32 to vector<4x32xf32>
    %41 = arith.select %39, %33, %40 : vector<4x32xi1>, vector<4x32xf32>
    %42 = tpu.concatenate %37, %0, %41 in 0 : vector<4x32xf32>, vector<4x32xf32>, vector<4x32xf32> -> vector<12x32xf32>
    %cst_13 = arith.constant dense<0.000000e+00> : vector<4x32xf32>
    %43 = tpu.matmul %1, %42, %cst_13 {dimension_numbers = #tpu.dot_dimension_numbers<[1], [0], [0], [1], [0, 0, 1, 1], [], []>} : vector<4x12xf32>, vector<12x32xf32>, vector<4x32xf32> -> vector<4x32xf32>
    %cst_14 = arith.constant dense<0.000000e+00> : vector<4xf32>
    %44 = vector.multi_reduction <add>, %43, %cst_14 [1] : vector<4x32xf32> to vector<4xf32>
    %45 = vector.shape_cast %44 : vector<4xf32> to vector<4x1xf32>
    %cst_15 = arith.constant 3.125000e-02 : f32
    %46 = vector.broadcast %cst_15 : f32 to vector<4x1xf32>
    %47 = arith.mulf %45, %46 : vector<4x1xf32>
    %48 = arith.mulf %43, %43 : vector<4x32xf32>
    %cst_16 = arith.constant dense<0.000000e+00> : vector<4xf32>
    %49 = vector.multi_reduction <add>, %48, %cst_16 [1] : vector<4x32xf32> to vector<4xf32>
    %50 = vector.shape_cast %49 : vector<4xf32> to vector<4x1xf32>
    %cst_17 = arith.constant 3.125000e-02 : f32
    %51 = vector.broadcast %cst_17 : f32 to vector<4x1xf32>
    %52 = arith.mulf %50, %51 : vector<4x1xf32>
    %53 = arith.mulf %47, %47 : vector<4x1xf32>
    %54 = arith.subf %52, %53 : vector<4x1xf32>
    %cst_18 = arith.constant 9.99999974E-6 : f32
    %55 = vector.broadcast %cst_18 : f32 to vector<4x1xf32>
    %56 = arith.addf %54, %55 : vector<4x1xf32>
    %57 = math.rsqrt %56 : vector<4x1xf32>
    %58 = arith.mulf %4, %57 : vector<4x1xf32>
    %59 = arith.mulf %47, %58 : vector<4x1xf32>
    %60 = arith.subf %5, %59 : vector<4x1xf32>
    %61 = vector.broadcast %58 : vector<4x1xf32> to vector<4x32xf32>
    %62 = arith.mulf %43, %61 : vector<4x32xf32>
    %63 = vector.broadcast %60 : vector<4x1xf32> to vector<4x32xf32>
    %64 = arith.addf %62, %63 : vector<4x32xf32>
    %cst_19 = arith.constant 0.000000e+00 : f32
    %65 = vector.broadcast %cst_19 : f32 to vector<4x32xf32>
    %66 = arith.maximumf %64, %65 : vector<4x32xf32>
    %cst_20 = arith.constant 0.000000e+00 : f32
    %67 = vector.broadcast %cst_20 : f32 to vector<4x1xf32>
    %68 = vector.extract_strided_slice %66 {offsets = [0, 0], sizes = [4, 31], strides = [1, 1]} : vector<4x32xf32> to vector<4x31xf32>
    %69 = tpu.concatenate %67, %68 in 1 : vector<4x1xf32>, vector<4x31xf32> -> vector<4x32xf32>
    %70 = vector.extract_strided_slice %66 {offsets = [0, 1], sizes = [4, 31], strides = [1, 1]} : vector<4x32xf32> to vector<4x31xf32>
    %71 = tpu.concatenate %70, %67 in 1 : vector<4x31xf32>, vector<4x1xf32> -> vector<4x32xf32>
    %cst_21 = arith.constant 0.000000e+00 : f32
    %72 = vector.shape_cast %26 : vector<1x32xi1> to vector<1x32xi1>
    %73 = vector.broadcast %72 : vector<1x32xi1> to vector<4x32xi1>
    %74 = vector.broadcast %cst_21 : f32 to vector<4x32xf32>
    %75 = arith.select %73, %69, %74 : vector<4x32xi1>, vector<4x32xf32>
    %cst_22 = arith.constant 0.000000e+00 : f32
    %76 = vector.shape_cast %28 : vector<1x32xi1> to vector<1x32xi1>
    %77 = vector.broadcast %76 : vector<1x32xi1> to vector<4x32xi1>
    %78 = vector.broadcast %cst_22 : f32 to vector<4x32xf32>
    %79 = arith.select %77, %71, %78 : vector<4x32xi1>, vector<4x32xf32>
    %80 = tpu.concatenate %75, %66, %79 in 0 : vector<4x32xf32>, vector<4x32xf32>, vector<4x32xf32> -> vector<12x32xf32>
    %cst_23 = arith.constant dense<0.000000e+00> : vector<4x32xf32>
    %81 = tpu.matmul %2, %80, %cst_23 {dimension_numbers = #tpu.dot_dimension_numbers<[1], [0], [0], [1], [0, 0, 1, 1], [], []>} : vector<4x12xf32>, vector<12x32xf32>, vector<4x32xf32> -> vector<4x32xf32>
    %cst_24 = arith.constant dense<0.000000e+00> : vector<4xf32>
    %82 = vector.multi_reduction <add>, %81, %cst_24 [1] : vector<4x32xf32> to vector<4xf32>
    %83 = vector.shape_cast %82 : vector<4xf32> to vector<4x1xf32>
    %cst_25 = arith.constant 3.125000e-02 : f32
    %84 = vector.broadcast %cst_25 : f32 to vector<4x1xf32>
    %85 = arith.mulf %83, %84 : vector<4x1xf32>
    %86 = arith.mulf %81, %81 : vector<4x32xf32>
    %cst_26 = arith.constant dense<0.000000e+00> : vector<4xf32>
    %87 = vector.multi_reduction <add>, %86, %cst_26 [1] : vector<4x32xf32> to vector<4xf32>
    %88 = vector.shape_cast %87 : vector<4xf32> to vector<4x1xf32>
    %cst_27 = arith.constant 3.125000e-02 : f32
    %89 = vector.broadcast %cst_27 : f32 to vector<4x1xf32>
    %90 = arith.mulf %88, %89 : vector<4x1xf32>
    %91 = arith.mulf %85, %85 : vector<4x1xf32>
    %92 = arith.subf %90, %91 : vector<4x1xf32>
    %cst_28 = arith.constant 9.99999974E-6 : f32
    %93 = vector.broadcast %cst_28 : f32 to vector<4x1xf32>
    %94 = arith.addf %92, %93 : vector<4x1xf32>
    %95 = math.rsqrt %94 : vector<4x1xf32>
    %96 = arith.mulf %6, %95 : vector<4x1xf32>
    %97 = arith.mulf %85, %96 : vector<4x1xf32>
    %98 = arith.subf %7, %97 : vector<4x1xf32>
    %99 = vector.broadcast %96 : vector<4x1xf32> to vector<4x32xf32>
    %100 = arith.mulf %81, %99 : vector<4x32xf32>
    %101 = vector.broadcast %98 : vector<4x1xf32> to vector<4x32xf32>
    %102 = arith.addf %100, %101 : vector<4x32xf32>
    %103 = arith.addf %102, %0 : vector<4x32xf32>
    %cst_29 = arith.constant 0.000000e+00 : f32
    %104 = vector.broadcast %cst_29 : f32 to vector<4x32xf32>
    %105 = arith.maximumf %103, %104 : vector<4x32xf32>
    %c0_30 = arith.constant 0 : index
    %c0_31 = arith.constant 0 : index
    %106 = vector.load %arg4[%c0_30, %c0_31] : memref<4x32xf32, #tpu.memory_space<vmem>>, vector<4x32xf32>
    tpu.vector_store %arg4[%c0_30, %c0_31], %105 {strides = array<i32>} : memref<4x32xf32, #tpu.memory_space<vmem>>, vector<4x32xf32>,
    return
  }
}

</mosaic_0001>

<bundles_post_ra>
// kernel: tpu_custom_call.1
= control target key start
LH: loop header
LB: loop body
LE: loop exit
PB: predicated region body
PF: predicated region fallthrough
CT: control target
= control target key end

     0   :  { %9 = vsyncpa [#allocation3], 0  ;;  %s591_s0 = inlined_call_operand.hbm [shape: f32[4,32], index: 0, kind: input, shape index: {}]   ;;  %s592_s1 = inlined_call_operand.hbm [shape: f32[4,12], index: 1, kind: input, shape index: {}]   ;;  %s593_s2 = inlined_call_operand.vmem [shape: f32[4,12], index: 2, kind: input, shape index: {}]   ;;  %s594_s3 = inlined_call_operand.vmem [shape: f32[4,4], index: 3, kind: input, shape index: {}]   ;;  %s595_s4 = inlined_call_operand.hbm [shape: f32[4,32], index: 4, kind: output, shape index: {}]  }
   0x1   :  { %10 = vsyncpa [#allocation6], 0 }
   0x2   :  { %11 = vsyncpa [#allocation4], 0  ;;  %s461_s15 = smov [#allocation2]   ;;  %s462_s17 = smov [#allocation5]  }
   0x3   :  { %s18_s16 = sshll.u32 %s461_s15, 4  ;;  %s28_s18 = sshll.u32 %s462_s17, 4  ;;  %s19_s16 = int_to_ptr.vmem [resolvable:$true] %s18_s16  ;;  %s29_s18 = int_to_ptr.vmem [resolvable:$true] %s28_s18 }
   0x4   :  { %s389_s21 = scalar_lea.hbm %s591_s0, 64 }
   0x5   :  { %p390_p0 = scmp.ne.s32.totalorder %s591_s0, %s389_s21  ;;  %p393_p1 = scmp.lt.u32.totalorder %s389_s21, %s591_s0 }
   0x7   :  { %p395_p2 = pnand %p393_p1, %p390_p0 }
   0x9   :  { %398 = shalt.err (!%p395_p2)
}
   0xa   :  { %s399_s26 = scalar_lea.vmem %s19_s16, 64  ;;  %p404_p4 = scmp.lt.s32.totalorder %s19_s16, %s19_s16 }
   0xb   :  { %p400_p3 = scmp.ne.s32.totalorder %s19_s16, %s399_s26  ;;  %p405_p5 = scmp.lt.s32.totalorder %s399_s26, %s399_s26 }
   0xd   :  { %p406_p6 = por %p405_p5, %p404_p4 }
   0xf   :  { %p407_p7 = pnand %p406_p6, %p400_p3 }
  0x11   :  { %410 = shalt.err (!%p407_p7)
}
  0x12   :  { %21 = dma.hbm_to_vmem [thread:$0]  %s591_s0, 64, %s19_s16, [#allocation3]  }
  0x13   :  { %s411_s5 = scalar_lea.hbm %s592_s1, 64 }
  0x14   :  { %p412_p8 = scmp.ne.s32.totalorder %s592_s1, %s411_s5  ;;  %p415_p9 = scmp.lt.u32.totalorder %s411_s5, %s592_s1 }
  0x16   :  { %p417_p10 = pnand %p415_p9, %p412_p8 }
  0x18   :  { %420 = shalt.err (!%p417_p10)
}
  0x19   :  { %s421_s10 = scalar_lea.vmem %s29_s18, 64  ;;  %p426_p12 = scmp.lt.s32.totalorder %s29_s18, %s29_s18 }
  0x1a   :  { %p422_p11 = scmp.ne.s32.totalorder %s29_s18, %s421_s10  ;;  %p427_p13 = scmp.lt.s32.totalorder %s421_s10, %s421_s10 }
  0x1c   :  { %p428_p0 = por %p427_p13, %p426_p12 }
  0x1e   :  { %p429_p1 = pnand %p428_p0, %p422_p11 }
  0x20   :  { %432 = shalt.err (!%p429_p1)
}
  0x21   :  { %31 = dma.hbm_to_vmem [thread:$0]  %s592_s1, 64, %s29_s18, [#allocation6]  }
  0x22   :  { %455 = dma.done.wait [#allocation3], 64  }
  0x23   :  { %456 = vsyncadd [#allocation3], 4294967232 }
  0x24   :  { %457 = dma.done.wait [#allocation6], 64  }
  0x25   :  { %458 = vsyncadd [#allocation6], 4294967232  ;;  %v463_v0 = vmov 0.0|0.0   ;;  %vm464_vm0 = vmmov 0   ;;  %v465_v1 = vmov 0.0   ;;  %s466_s12 = smov 1   ;;  %v46_v3 = vlaneseq }
  0x26   :  { %359 = vmatprep.subr.bf16.mxu0 %v463_v0  ;;  %363 = vmatprep.subr.bf16.mxu1 %v463_v0  ;;  %v523_v2 = vld [vmem:[#allocation2] sm:$0xf]  ;;  %s467_s13 = smov 127   ;;  %vm66_vm1 = vcmask 7168   ;;  %vm71_vm3 = vcmask 252928   ;;  %vm81_vm5 = vcmask 1043456  }
  0x27   :  { %349 = vmatprep.mubr.msk.f32.mxu0 %vm464_vm0, %v465_v1  ;;  %356 = vmatprep.mubr.msk.f32.mxu1 %vm464_vm0, %v465_v1  ;;  %v47_v4 = vand.u32 127, %v46_v3  ;;  %v79_v9 = vrot.slane %v523_v2, 4  ;;  %vm468_vm6 = vmmov 1   ;;  %v43_v18 = vld [vmem:[#allocation5] sm:$0xf]  ;;  %vm83_vm8 = vcmask 97280  }
  0x28   :  { %63 = vrot.lane.b32.xlu0 %v523_v2, %s466_s12  ;;  %vm546_vm7 = vmpackc.low %vm81_vm5, %vm468_vm6  ;;  %vm160_vm9 = vcmask 257024   ;;  %v469_v24 = vmov 0   ;;  %v470_v32 = vmov 1   ;;  %v45_v33 = vld [vmem:[%s594_s3] sm:$0xf]  ;;  %v471_v59 = vmov 2  }
  0x29   :  { %v52_v5 = vand.u32 15, %v47_v4  ;;  %380 = vset.pattern.permute.xlu1 %v469_v24  ;;  %381 = vset.pattern.permute.xlu0 %v470_v32  ;;  %v44_v53 = vld [vmem:[%s593_s2] sm:$0xf]  ;;  %v472_v4 = vmov 3   ;;  %s473_s2 = smov [#allocation7]  }
  0x2a   :  { %s325_s16 = sshll.u32 %s473_s2, 4  ;;  %s326_s16 = int_to_ptr.vmem [resolvable:$true] %s325_s16 }
  0x2b   :  { %vm529_vm2 = vcmp.ne.s32.totalorder %v52_v5, 0  ;;  %vm537_vm4 = vcmp.ne.s32.totalorder %v52_v5, 15  ;;  %s433_s17 = scalar_lea.vmem %s326_s16, 64  ;;  %p438_p3 = scmp.lt.s32.totalorder %s326_s16, %s326_s16 }
  0x2c   :  { %68 = vrot.lane.b32.xlu0 %v523_v2, %s467_s13  ;;  %p434_p2 = scmp.ne.s32.totalorder %s326_s16, %s433_s17  ;;  %p439_p4 = scmp.lt.s32.totalorder %s433_s17, %s433_s17 }
  0x2e   :  { %p440_p5 = por %p439_p4, %p438_p3 }
  0x30   :  { %p441_p6 = pnand %p440_p5, %p434_p2 }
  0x9a   :  { %v64_v7 = vpop.permute.xlu0 %63 }
  0x9b   :  { %v67_v8 = vsel %vm66_vm1, 0.0, %v64_v7 }
  0x9c   :  { %v75_v10 = vsel %vm529_vm2, %v67_v8, 0.0 }
  0x9d   :  { %v82_v15 = vsel %vm81_vm5, %v75_v10, %v79_v9 }
  0x9e   :  { %v69_v12 = vpop.permute.xlu0 %68 }
  0x9f   :  { %v72_v13 = vsel %vm71_vm3, %v69_v12, 0.0 }
  0xa0   :  { %v78_v14 = vsel %vm537_vm4, %v72_v13, 0.0 }
  0xa1   :  { %v360_v17 = vpack.c.bf16 %v78_v14, %v82_v15 }
  0xa3   :  { %362 = vmatpush3.bf16.msk.msra.mxu0 %vm546_vm7, %v360_v17 }
  0xa6   :  { %350 = vmatmul.mubr.msk.f32.vlgmr.msra.gmra.mrb[0].mxu0 %vm83_vm8, %v43_v18 }
 0x179   :  { %v156_v19 = vpop.f32.mrb[0].mxu0 }
 0x17a   :  { %v351_v20 = vpop.f32.mrb[1].mxu0  ;;  %v161_v21 = vsel %vm160_vm9, %v156_v19, 0.0  ;;  %v165_v22 = vmul.f32 %v156_v19, %v156_v19 }
 0x17b   :  { %162 = vadd.xlane.f32.xlu1 %v161_v21 }
 0x17c   :  { %v166_v23 = vsel %vm160_vm9, %v165_v22, 0.0 }
 0x17f   :  { %167 = vadd.xlane.f32.xlu1 %v166_v23 }
 0x208   :  { %v163_v25 = vpop.xlane.xlu1 %162 }
 0x209   :  { %v164_v26 = vmul.f32 0.03125, %v163_v25 }
 0x20b   :  { %v170_v28 = vmul.f32 %v164_v26, %v164_v26 }
 0x20c   :  { %v168_v27 = vpop.xlane.xlu1 %167 }
 0x20d   :  { %v169_v29 = vmul.f32 0.03125, %v168_v27 }
 0x20f   :  { %v171_v30 = vsub.f32 %v169_v29, %v170_v28 }
 0x211   :  { %v172_v31 = vadd.f32 1e-05, %v171_v30 }
 0x213   :  { %385 = vrsqrt.f32 %v172_v31 }
 0x21d   :  { %v386_v34 = vpop.eup %385 }
 0x21e   :  { %v174_v35 = vmul.f32 %v386_v34, %v45_v33 }
 0x220   :  { %183 = vperm.xlu1 %380, %v174_v35   ;;  %v175_v36 = vmul.f32 %v174_v35, %v164_v26 }
 0x222   :  { %177 = vrot.lane.b32.xlu0 %v175_v36, %s466_s12 }
 0x224   :  { %382 = vset.pattern.permute.xlu1 %v471_v59 }
 0x294   :  { %v178_v37 = vpop.permute.xlu0 %177 }
 0x295   :  { %v180_v38 = vsub.f32 %v45_v33, %v178_v37 }
 0x297   :  { %189 = vperm.xlu0 %381, %v180_v38  }
 0x29b   :  { %384 = vset.pattern.permute.xlu0 %v472_v4 }
 0x29f   :  { %v184_v39 = vpop.permute.xlu1 %183 }
 0x2a0   :  { %v186_v40 = vmul.f32 %v184_v39, %v156_v19 }
 0x316   :  { %v190_v41 = vpop.permute.xlu0 %189 }
 0x317   :  { %v192_v42 = vadd.f32 %v190_v41, %v186_v40 }
 0x319   :  { %v193_v43 = vmax.f32 %v192_v42, 0.0 }
 0x31b   :  { %195 = vrot.lane.b32.xlu0 %v193_v43, %s466_s12  ;;  %v205_v47 = vrot.slane %v193_v43, 4 }
 0x31f   :  { %199 = vrot.lane.b32.xlu0 %v193_v43, %s467_s13 }
 0x38d   :  { %v196_v44 = vpop.permute.xlu0 %195 }
 0x38e   :  { %v198_v45 = vsel %vm66_vm1, 0.0, %v196_v44 }
 0x38f   :  { %v203_v46 = vsel %vm529_vm2, %v198_v45, 0.0 }
 0x390   :  { %v207_v51 = vsel %vm81_vm5, %v203_v46, %v205_v47 }
 0x391   :  { %v200_v48 = vpop.permute.xlu0 %199 }
 0x392   :  { %v202_v49 = vsel %vm71_vm3, %v200_v48, 0.0 }
 0x393   :  { %v204_v50 = vsel %vm537_vm4, %v202_v49, 0.0 }
 0x394   :  { %v364_v52 = vpack.c.bf16 %v204_v50, %v207_v51 }
 0x396   :  { %366 = vmatpush3.bf16.msk.msra.mxu1 %vm546_vm7, %v364_v52 }
 0x399   :  { %357 = vmatmul.mubr.msk.f32.vlgmr.msra.gmra.mrb[0].mxu1 %vm83_vm8, %v44_v53 }
 0x46c   :  { %v280_v54 = vpop.f32.mrb[0].mxu1 }
 0x46d   :  { %v358_v55 = vpop.f32.mrb[1].mxu1  ;;  %v284_v56 = vsel %vm160_vm9, %v280_v54, 0.0  ;;  %v288_v57 = vmul.f32 %v280_v54, %v280_v54 }
 0x46e   :  { %285 = vadd.xlane.f32.xlu1 %v284_v56 }
 0x46f   :  { %v289_v58 = vsel %vm160_vm9, %v288_v57, 0.0 }
 0x470   :  { %290 = vadd.xlane.f32.xlu0 %v289_v58 }
 0x4fb   :  { %v286_v60 = vpop.xlane.xlu1 %285 }
 0x4fc   :  { %v287_v61 = vmul.f32 0.03125, %v286_v60 }
 0x4fd   :  { %v291_v62 = vpop.xlane.xlu0 %290 }
 0x4fe   :  { %v293_v63 = vmul.f32 %v287_v61, %v287_v61  ;;  %v292_v0 = vmul.f32 0.03125, %v291_v62 }
 0x500   :  { %v294_v1 = vsub.f32 %v292_v0, %v293_v63 }
 0x502   :  { %v295_v3 = vadd.f32 1e-05, %v294_v1 }
 0x504   :  { %387 = vrsqrt.f32 %v295_v3 }
 0x50e   :  { %v388_v5 = vpop.eup %387 }
 0x50f   :  { %v297_v6 = vmul.f32 %v388_v5, %v45_v33 }
 0x511   :  { %306 = vperm.xlu1 %382, %v297_v6   ;;  %v298_v7 = vmul.f32 %v297_v6, %v287_v61 }
 0x513   :  { %300 = vrot.lane.b32.xlu0 %v298_v7, %s466_s12 }
 0x515   :  { %383 = vset.pattern.permute.xlu1 %v472_v4 }
 0x585   :  { %v301_v8 = vpop.permute.xlu0 %300 }
 0x586   :  { %v303_v9 = vsub.f32 %v45_v33, %v301_v8 }
 0x588   :  { %312 = vperm.xlu1 %383, %v303_v9  }
 0x590   :  { %v307_v10 = vpop.permute.xlu1 %306 }
 0x591   :  { %v309_v11 = vmul.f32 %v307_v10, %v280_v54 }
 0x607   :  { %v313_v12 = vpop.permute.xlu1 %312 }
 0x608   :  { %v315_v13 = vadd.f32 %v313_v12, %v309_v11 }
 0x60a   :  { %v316_v14 = vadd.f32 %v315_v13, %v523_v2 }
 0x60c   :  { %v317_v15 = vmax.f32 %v316_v14, 0.0 }
 0x60e   :  { %318 = vst.msk [vmem:[#allocation7] sm:$0xf] %vm160_vm9, %v317_v15 }
 0x60f   :  { %444 = shalt.err (!%p441_p6)
}
 0x610   :  { %s445_s20 = scalar_lea.hbm %s595_s4, 64 }
 0x611   :  { %p446_p7 = scmp.ne.s32.totalorder %s595_s4, %s445_s20  ;;  %p449_p8 = scmp.lt.u32.totalorder %s445_s20, %s595_s4 }
 0x613   :  { %p451_p9 = pnand %p449_p8, %p446_p7 }
 0x615   :  { %454 = shalt.err (!%p451_p9)
}
 0x616   :  { %328 = dma.vmem_to_hbm [thread:$0]  %s326_s16, 64, %s595_s4, [#allocation4]  }
 0x617   :  { %459 = dma.done.wait [#allocation4], 64  }
 0x618   :  { %460 = vsyncadd [#allocation4], 4294967232 }
 0x619   :  { %332 = vsyncpa [#allocation3], 1 }
 0x61a   :  { %333 = vsyncpa [#allocation6], 1 }
 0x61b   :  { %334 = vsyncpa [#allocation4], 1 }

</bundles_post_ra>
